<compile_context>
chip_gen: v6e
topology: v6e:2x2x1
jax: 0.10.0
libtpu: 0.0.40
codegen_flags: <defaults>
</compile_context>

<pallas_src>
import functools
import math

import jax
import jax.numpy as jnp
from jax import lax
from jax.experimental import pallas as pl
from jax.experimental.pallas import tpu as pltpu


_NEG = -1e30                       # finite "masked" sentinel (avoids NaN)
_LOG2E = 1.4426950408889634


def _tile_caps():
    """Generation-aware (tq, tkv) caps: v5e/v6e (128 MiB VMEM) vs v7x (64 MiB)."""
    try:
        vmem_bytes = pltpu.get_tpu_info().vmem_capacity_bytes
    except Exception:
        vmem_bytes = 64 << 20
    if vmem_bytes >= (100 << 20):
        return 512, 1024           # v5e / v6e
    return 256, 512                # v7x


def _choose_tiles(S, tq_cap, tkv_cap):
    """Pick (tq, tkv, padded_S)."""
    if S <= min(tq_cap, tkv_cap):
        return S, S, S             # single block per axis (block == full dim is legal)
    s_pad = 128 * ((S + 127) // 128)   # keep (8,128)-aligned tiles for large S

    def pick(cap):
        for t in (1024, 512, 256, 128):
            if t <= cap and s_pad % t == 0:
                return t
        return 128

    return pick(tq_cap), pick(tkv_cap), s_pad


def _attn_kernel(*refs, n_heads, head_dim, s_valid, s_pad, mask_mode, mxu_dtype):
    if mask_mode in ("dense", "dense_heads"):
        q_ref, k_ref, v_ref, m_ref, o_ref, m_sc, l_sc, acc_sc = refs
    else:
        q_ref, k_ref, v_ref, o_ref, m_sc, l_sc, acc_sc = refs
        m_ref = None

    tq = q_ref.shape[1]
    tkv = k_ref.shape[1]
    kv_idx = pl.program_id(2)
    n_kv = pl.num_programs(2)
    q_off = pl.program_id(1) * tq
    kv_off = kv_idx * tkv

    @pl.when(kv_idx == 0)
    def _init():
        m_sc[...] = jnp.full(m_sc.shape, _NEG, dtype=m_sc.dtype)
        l_sc[...] = jnp.zeros(l_sc.shape, dtype=l_sc.dtype)
        acc_sc[...] = jnp.zeros(acc_sc.shape, dtype=acc_sc.dtype)

    def _compute():
        # 1/sqrt(Dh) and log2(e) folded into q so the softmax uses exp2 (EUP).
        scale = jnp.asarray(_LOG2E / math.sqrt(head_dim), dtype=q_ref.dtype)
        q = (q_ref[0] * scale).astype(mxu_dtype)      # (tq,  D)
        kk = k_ref[0].astype(mxu_dtype)               # (tkv, D)
        vv = v_ref[0].astype(mxu_dtype)               # (tkv, D)

        # Head-invariant additive bias, built ONCE per (q, kv) tile.
        bias = None
        if mask_mode == "causal":
            q_pos = q_off + lax.broadcasted_iota(jnp.int32, (tq, tkv), 0)
            k_pos = kv_off + lax.broadcasted_iota(jnp.int32, (tq, tkv), 1)
            bias = jnp.where(k_pos <= q_pos, 0.0, _NEG).astype(jnp.float32)
        elif mask_mode == "dense":
            bias = jnp.where(m_ref[0, 0] == 0, _NEG, 0.0).astype(jnp.float32)
        if s_pad != s_valid and mask_mode in ("none", "causal"):
            # Padded keys (positions >= s_valid) must not receive weight.
            k_pos = kv_off + lax.broadcasted_iota(jnp.int32, (tq, tkv), 1)
            kpad = jnp.where(k_pos < s_valid, 0.0, _NEG).astype(jnp.float32)
            bias = kpad if bias is None else bias + kpad

        for h in range(n_heads):                      # static unroll over heads
            lo, hi = h * head_dim, (h + 1) * head_dim
            # scores (base-2 logits): contract head_dim of both operands — no
            # explicit k.T, f32 accumulation on the MXU.
            s2 = lax.dot_general(
                q[:, lo:hi], kk[:, lo:hi], (((1,), (1,)), ((), ())),
                preferred_element_type=jnp.float32)   # (tq, tkv)
            if bias is not None:
                s2 = s2 + bias
            if mask_mode == "dense_heads":
                s2 = s2 + jnp.where(m_ref[0, h] == 0, _NEG, 0.0).astype(jnp.float32)

            m_prev = m_sc[h]                                            # (tq, 1)
            m_new = jnp.maximum(m_prev, jnp.max(s2, axis=-1, keepdims=True))
            alpha = jnp.exp2(m_prev - m_new)
            p = jnp.exp2(s2 - m_new)                                    # (tq, tkv)
            l_sc[h] = alpha * l_sc[h] + jnp.sum(p, axis=-1, keepdims=True)
            acc_sc[:, lo:hi] = alpha * acc_sc[:, lo:hi] + lax.dot_general(
                p.astype(mxu_dtype), vv[:, lo:hi], (((1,), (0,)), ((), ())),
                preferred_element_type=jnp.float32)
            m_sc[h] = m_new

    if mask_mode == "causal":
        # Skip KV blocks entirely in the future of every query of this tile.
        @pl.when(kv_off <= q_off + tq - 1)
        def _():
            _compute()
    else:
        _compute()

    @pl.when(kv_idx == n_kv - 1)
    def _finalize():
        for h in range(n_heads):
            lo, hi = h * head_dim, (h + 1) * head_dim
            denom = l_sc[h]
            inv = pl.reciprocal(denom, approx=True)
            inv = inv * (2.0 - denom * inv)           # 1 Newton step -> ~f32 exact
            o_ref[0, :, lo:hi] = (acc_sc[:, lo:hi] * inv).astype(o_ref.dtype)


def spatial_attention(q, k, v, mask=None, *, n_heads, causal=False, mxu_dtype=None):
    """Pallas equivalent of SpatialAttention.forward.

    q, k, v: (B, S, d_model)
    mask:    optional, broadcastable to (B, n_heads, S, S); 0 => masked out.
    causal:  build a causal mask in-kernel (mutually exclusive with `mask`).
    mxu_dtype: dtype of the MXU feeds (e.g. jnp.bfloat16 for f32 inputs);
               defaults to the input dtype. Accumulation / softmax stay f32.
    returns: (B, S, d_model)
    """
    B, S, d_model = q.shape
    assert d_model % n_heads == 0, "d_model must be divisible by n_heads"
    head_dim = d_model // n_heads
    if causal and mask is not None:
        raise ValueError("pass either causal=True or an explicit mask, not both")
    if mxu_dtype is None:
        mxu_dtype = q.dtype
    mxu_dtype = jnp.dtype(mxu_dtype)

    tq_cap, tkv_cap = _tile_caps()
    tq, tkv, s_pad = _choose_tiles(S, tq_cap, tkv_cap)

    if s_pad != S:
        pad = ((0, 0), (0, s_pad - S), (0, 0))
        q = jnp.pad(q, pad)
        k = jnp.pad(k, pad)
        v = jnp.pad(v, pad)

    # ---- mask handling ----------------------------------------------------
    if causal:
        mask_mode = "causal"
    elif mask is None:
        mask_mode = "none"
    else:
        m = jnp.asarray(mask)
        while m.ndim < 4:                 # numpy-style right-aligned broadcast
            m = m[None]
        if m.shape[1] == 1:
            mask_mode = "dense"           # common case: head-invariant mask
            m = jnp.broadcast_to(m, (B, 1, S, S)).astype(jnp.int8)
        else:
            mask_mode = "dense_heads"     # rare: genuinely per-head mask
            m = jnp.broadcast_to(m, (B, n_heads, S, S)).astype(jnp.int8)
        if s_pad != S:
            # zero-padding == masked, so padded keys/queries are handled too.
            m = jnp.pad(m, ((0, 0), (0, 0), (0, s_pad - S), (0, s_pad - S)))

    grid = (B, s_pad // tq, s_pad // tkv)

    q_spec = pl.BlockSpec((1, tq, d_model), lambda b, i, j: (b, i, 0))
    kv_spec = pl.BlockSpec((1, tkv, d_model), lambda b, i, j: (b, j, 0))
    o_spec = pl.BlockSpec((1, tq, d_model), lambda b, i, j: (b, i, 0))
    in_specs = [q_spec, kv_spec, kv_spec]
    args = [q, k, v]
    mask_block_bytes = 0
    mask_hbm_bytes = 0
    if mask_mode in ("dense", "dense_heads"):
        h_blk = 1 if mask_mode == "dense" else n_heads
        in_specs.append(pl.BlockSpec((1, h_blk, tq, tkv), lambda b, i, j: (b, 0, i, j)))
        args.append(m)
        mask_block_bytes = h_blk * tq * tkv
        mask_hbm_bytes = B * h_blk * s_pad * s_pad

    kernel = functools.partial(
        _attn_kernel, n_heads=n_heads, head_dim=head_dim, s_valid=S, s_pad=s_pad,
        mask_mode=mask_mode, mxu_dtype=mxu_dtype)

    itm = jnp.dtype(q.dtype).itemsize
    vmem_est = (2 * tq * d_model * itm          # q (double-buffered)
                + 4 * tkv * d_model * itm       # k + v (double-buffered)
                + 2 * tq * d_model * itm        # output (double-buffered)
                + tq * d_model * 4              # f32 accumulator scratch
                + 2 * n_heads * tq * 128 * 4    # m/l scratch (lane-padded)
                + 2 * mask_block_bytes          # int8 mask block
                + 2 * tq * tkv * 4)             # live f32 scores/probs
    vmem_limit = int(min(max(2 * vmem_est, 32 << 20), 100 << 20))

    cost = pl.CostEstimate(
        flops=4 * B * s_pad * s_pad * d_model,
        transcendentals=B * n_heads * s_pad * s_pad,
        bytes_accessed=int(4 * B * s_pad * d_model * itm + mask_hbm_bytes))

    out = pl.pallas_call(
        kernel,
        out_shape=jax.ShapeDtypeStruct((B, s_pad, d_model), q.dtype),
        grid_spec=pltpu.PrefetchScalarGridSpec(
            num_scalar_prefetch=0,
            grid=grid,
            in_specs=in_specs,
            out_specs=o_spec,
            scratch_shapes=[
                pltpu.VMEM((n_heads, tq, 1), jnp.float32),   # running max (base-2)
                pltpu.VMEM((n_heads, tq, 1), jnp.float32),   # running denominator
                pltpu.VMEM((tq, d_model), jnp.float32),      # output accumulator
            ]),
        compiler_params=pltpu.CompilerParams(
            dimension_semantics=("parallel", "parallel", "arbitrary"),
            vmem_limit_bytes=vmem_limit),
        cost_estimate=cost,
    )(*args)

    if s_pad != S:
        out = out[:, :S, :]
    return out


def _reference(q, k, v, n_heads, mask=None):
    B, S, D = q.shape
    dh = D // n_heads
    qh = q.reshape(B, S, n_heads, dh).transpose(0, 2, 1, 3)
    kh = k.reshape(B, S, n_heads, dh).transpose(0, 2, 1, 3)
    vh = v.reshape(B, S, n_heads, dh).transpose(0, 2, 1, 3)
    scores = jnp.einsum("bhqd,bhkd->bhqk", qh, kh) / math.sqrt(dh)
    if mask is not None:
        scores = jnp.where(jnp.broadcast_to(mask, scores.shape) == 0, -jnp.inf, scores)
    attn = jax.nn.softmax(scores, axis=-1)
    out = jnp.einsum("bhqk,bhkd->bhqd", attn, vh)
    return out.transpose(0, 2, 1, 3).reshape(B, S, D)


if __name__ == "__main__":
    # Config implied by the module: d_model=32, n_heads=4 -> head_dim=8; B=2, S=8.
    B, S, d_model, n_heads = 2, 8, 32, 4

    key = jax.random.PRNGKey(0)
    kq, kk, kv_ = jax.random.split(key, 3)
    q = jax.random.normal(kq, (B, S, d_model), dtype=jnp.float32)
    k = jax.random.normal(kk, (B, S, d_model), dtype=jnp.float32)
    v = jax.random.normal(kv_, (B, S, d_model), dtype=jnp.float32)

    # 1) mask=None fast path (no mask DMA at all).
    out = jax.block_until_ready(spatial_attention(q, k, v, n_heads=n_heads))
    ref = _reference(q, k, v, n_heads)
    assert out.shape == (B, S, d_model)
    assert jnp.allclose(out, ref, atol=1e-5, rtol=1e-5), "mismatch (no mask)"

    # 2) dense head-invariant mask: stays (B,1,S,S) int8, converted once per
    #    tile into an additive bias shared by all heads.
    causal_mask = jnp.broadcast_to(
        jnp.tril(jnp.ones((S, S), dtype=jnp.int32))[None, None], (B, 1, S, S))
    out_m = jax.block_until_ready(
        spatial_attention(q, k, v, mask=causal_mask, n_heads=n_heads))
    ref_m = _reference(q, k, v, n_heads, mask=causal_mask)
    assert jnp.allclose(out_m, ref_m, atol=1e-5, rtol=1e-5), "mismatch (dense mask)"

    # 3) statically-known causal mask built in-kernel (zero mask HBM traffic,
    #    future KV blocks skipped).
    out_c = jax.block_until_ready(
        spatial_attention(q, k, v, n_heads=n_heads, causal=True))
    assert jnp.allclose(out_c, ref_m, atol=1e-5, rtol=1e-5), "mismatch (causal)"

    # 4) rare per-head dense mask path.
    mask_ph = jnp.broadcast_to(causal_mask, (B, n_heads, S, S))
    out_ph = jax.block_until_ready(
        spatial_attention(q, k, v, mask=mask_ph, n_heads=n_heads))
    assert jnp.allclose(out_ph, ref_m, atol=1e-5, rtol=1e-5), "mismatch (per-head mask)"

    # 5) bf16 MXU feeds for f32 inputs (f32 accumulation + f32 softmax kept).
    out_bf = jax.block_until_ready(
        spatial_attention(q, k, v, n_heads=n_heads, mxu_dtype=jnp.bfloat16))
    assert jnp.allclose(out_bf, ref, atol=1e-1, rtol=1e-2), "mismatch (bf16 MXU feeds)"

    print("KERNEL_OK")
</pallas_src>

<mosaic_0001>
module attributes {stable_mosaic.version = 11 : i64} {
  func.func @_attn_kernel(%arg0: i32, %arg1: i32, %arg2: i32, %arg3: memref<1x8x32xf32, #tpu.memory_space<vmem>>, %arg4: memref<1x8x32xf32, #tpu.memory_space<vmem>>, %arg5: memref<1x8x32xf32, #tpu.memory_space<vmem>>, %arg6: memref<1x8x32xf32, #tpu.memory_space<vmem>>, %arg7: memref<4x8x1xf32, #tpu.memory_space<vmem>>, %arg8: memref<4x8x1xf32, #tpu.memory_space<vmem>>, %arg9: memref<8x32xf32, #tpu.memory_space<vmem>>) attributes {dimension_semantics = [#tpu.dimension_semantics<parallel>, #tpu.dimension_semantics<parallel>, #tpu.dimension_semantics<arbitrary>], iteration_bounds = array<i64: 2, 1, 1>, scalar_prefetch = 0 : i64, scratch_operands = 3 : i64, tpu.core_type = #tpu.core_type<tc>, window_params = [{transform_indices = @transform_0, window_bounds = array<i64: 1, 8, 32>}, {transform_indices = @transform_1, window_bounds = array<i64: 1, 8, 32>}, {transform_indices = @transform_2, window_bounds = array<i64: 1, 8, 32>}, {transform_indices = @transform_3, window_bounds = array<i64: 1, 8, 32>}]} {
    %c0_i32 = arith.constant 0 : i32
    %0 = arith.cmpi eq, %arg2, %c0_i32 : i32
    %1 = arith.extui %0 : i1 to i32
    %c0_i32_0 = arith.constant 0 : i32
    %2 = arith.cmpi ne, %1, %c0_i32_0 : i32
    scf.if %2 {
      %cst_85 = arith.constant -1.000000e+30 : f32
      %142 = vector.broadcast %cst_85 : f32 to vector<4x8x1xf32>
      %c0_86 = arith.constant 0 : index
      %c0_87 = arith.constant 0 : index
      %c0_88 = arith.constant 0 : index
      %143 = vector.load %arg7[%c0_86, %c0_87, %c0_88] : memref<4x8x1xf32, #tpu.memory_space<vmem>>, vector<4x8x1xf32>
      tpu.vector_store %arg7[%c0_86, %c0_87, %c0_88], %142 {strides = array<i32>} : memref<4x8x1xf32, #tpu.memory_space<vmem>>, vector<4x8x1xf32>,
      %cst_89 = arith.constant 0.000000e+00 : f32
      %144 = vector.broadcast %cst_89 : f32 to vector<4x8x1xf32>
      %c0_90 = arith.constant 0 : index
      %c0_91 = arith.constant 0 : index
      %c0_92 = arith.constant 0 : index
      %145 = vector.load %arg8[%c0_90, %c0_91, %c0_92] : memref<4x8x1xf32, #tpu.memory_space<vmem>>, vector<4x8x1xf32>
      tpu.vector_store %arg8[%c0_90, %c0_91, %c0_92], %144 {strides = array<i32>} : memref<4x8x1xf32, #tpu.memory_space<vmem>>, vector<4x8x1xf32>,
      %cst_93 = arith.constant 0.000000e+00 : f32
      %146 = vector.broadcast %cst_93 : f32 to vector<8x32xf32>
      %c0_94 = arith.constant 0 : index
      %c0_95 = arith.constant 0 : index
      %147 = vector.load %arg9[%c0_94, %c0_95] : memref<8x32xf32, #tpu.memory_space<vmem>>, vector<8x32xf32>
      tpu.vector_store %arg9[%c0_94, %c0_95], %146 {strides = array<i32>} : memref<8x32xf32, #tpu.memory_space<vmem>>, vector<8x32xf32>,
    } else {
    }
    %c0 = arith.constant 0 : index
    %c0_1 = arith.constant 0 : index
    %c0_2 = arith.constant 0 : index
    %3 = vector.load %arg3[%c0, %c0_1, %c0_2] : memref<1x8x32xf32, #tpu.memory_space<vmem>>, vector<1x8x32xf32>
    %4 = vector.shape_cast %3 : vector<1x8x32xf32> to vector<8x32xf32>
    %cst = arith.constant 0.510069728 : f32
    %5 = vector.broadcast %cst : f32 to vector<8x32xf32>
    %6 = arith.mulf %4, %5 : vector<8x32xf32>
    %c0_3 = arith.constant 0 : index
    %c0_4 = arith.constant 0 : index
    %c0_5 = arith.constant 0 : index
    %7 = vector.load %arg4[%c0_3, %c0_4, %c0_5] : memref<1x8x32xf32, #tpu.memory_space<vmem>>, vector<1x8x32xf32>
    %8 = vector.shape_cast %7 : vector<1x8x32xf32> to vector<8x32xf32>
    %c0_6 = arith.constant 0 : index
    %c0_7 = arith.constant 0 : index
    %c0_8 = arith.constant 0 : index
    %9 = vector.load %arg5[%c0_6, %c0_7, %c0_8] : memref<1x8x32xf32, #tpu.memory_space<vmem>>, vector<1x8x32xf32>
    %10 = vector.shape_cast %9 : vector<1x8x32xf32> to vector<8x32xf32>
    %11 = vector.extract_strided_slice %6 {offsets = [0, 0], sizes = [8, 8], strides = [1, 1]} : vector<8x32xf32> to vector<8x8xf32>
    %12 = vector.extract_strided_slice %8 {offsets = [0, 0], sizes = [8, 8], strides = [1, 1]} : vector<8x32xf32> to vector<8x8xf32>
    %cst_9 = arith.constant dense<0.000000e+00> : vector<8x8xf32>
    %13 = tpu.matmul %11, %12, %cst_9 {dimension_numbers = #tpu.dot_dimension_numbers<[1], [1], [0], [0], [0, 0, 1, 0], [], []>} : vector<8x8xf32>, vector<8x8xf32>, vector<8x8xf32> -> vector<8x8xf32>
    %c0_10 = arith.constant 0 : index
    %c0_11 = arith.constant 0 : index
    %c0_12 = arith.constant 0 : index
    %14 = vector.load %arg7[%c0_10, %c0_11, %c0_12] : memref<4x8x1xf32, #tpu.memory_space<vmem>>, vector<1x8x1xf32>
    %15 = vector.shape_cast %14 : vector<1x8x1xf32> to vector<8x1xf32>
    %cst_13 = arith.constant dense<0xFF800000> : vector<8xf32>
    %16 = vector.multi_reduction <maximumf>, %13, %cst_13 [1] : vector<8x8xf32> to vector<8xf32>
    %17 = vector.shape_cast %16 : vector<8xf32> to vector<8x1xf32>
    %18 = arith.maximumf %15, %17 : vector<8x1xf32>
    %19 = arith.subf %15, %18 : vector<8x1xf32>
    %20 = math.exp2 %19 : vector<8x1xf32>
    %21 = vector.broadcast %18 : vector<8x1xf32> to vector<8x8xf32>
    %22 = arith.subf %13, %21 : vector<8x8xf32>
    %23 = math.exp2 %22 : vector<8x8xf32>
    %c0_14 = arith.constant 0 : index
    %c0_15 = arith.constant 0 : index
    %c0_16 = arith.constant 0 : index
    %24 = vector.load %arg8[%c0_14, %c0_15, %c0_16] : memref<4x8x1xf32, #tpu.memory_space<vmem>>, vector<1x8x1xf32>
    %25 = vector.shape_cast %24 : vector<1x8x1xf32> to vector<8x1xf32>
    %26 = arith.mulf %20, %25 : vector<8x1xf32>
    %cst_17 = arith.constant dense<0.000000e+00> : vector<8xf32>
    %27 = vector.multi_reduction <add>, %23, %cst_17 [1] : vector<8x8xf32> to vector<8xf32>
    %28 = vector.shape_cast %27 : vector<8xf32> to vector<8x1xf32>
    %29 = arith.addf %26, %28 : vector<8x1xf32>
    %c0_18 = arith.constant 0 : index
    %c0_19 = arith.constant 0 : index
    %c0_20 = arith.constant 0 : index
    %30 = vector.load %arg8[%c0_18, %c0_19, %c0_20] : memref<4x8x1xf32, #tpu.memory_space<vmem>>, vector<1x8x1xf32>
    %31 = vector.shape_cast %30 : vector<1x8x1xf32> to vector<8x1xf32>
    %32 = vector.shape_cast %29 : vector<8x1xf32> to vector<1x8x1xf32>
    tpu.vector_store %arg8[%c0_18, %c0_19, %c0_20], %32 {strides = array<i32>} : memref<4x8x1xf32, #tpu.memory_space<vmem>>, vector<1x8x1xf32>,
    %c0_21 = arith.constant 0 : index
    %c0_22 = arith.constant 0 : index
    %33 = vector.load %arg9[%c0_21, %c0_22] : memref<8x32xf32, #tpu.memory_space<vmem>>, vector<8x8xf32>
    %34 = vector.broadcast %20 : vector<8x1xf32> to vector<8x8xf32>
    %35 = arith.mulf %34, %33 : vector<8x8xf32>
    %36 = vector.extract_strided_slice %10 {offsets = [0, 0], sizes = [8, 8], strides = [1, 1]} : vector<8x32xf32> to vector<8x8xf32>
    %cst_23 = arith.constant dense<0.000000e+00> : vector<8x8xf32>
    %37 = tpu.matmul %23, %36, %cst_23 {dimension_numbers = #tpu.dot_dimension_numbers<[1], [0], [0], [1], [0, 0, 1, 1], [], []>} : vector<8x8xf32>, vector<8x8xf32>, vector<8x8xf32> -> vector<8x8xf32>
    %38 = arith.addf %35, %37 : vector<8x8xf32>
    %c0_24 = arith.constant 0 : index
    %c0_25 = arith.constant 0 : index
    %39 = vector.load %arg9[%c0_24, %c0_25] : memref<8x32xf32, #tpu.memory_space<vmem>>, vector<8x8xf32>
    tpu.vector_store %arg9[%c0_24, %c0_25], %38 {strides = array<i32>} : memref<8x32xf32, #tpu.memory_space<vmem>>, vector<8x8xf32>,
    %c0_26 = arith.constant 0 : index
    %c0_27 = arith.constant 0 : index
    %c0_28 = arith.constant 0 : index
    %40 = vector.load %arg7[%c0_26, %c0_27, %c0_28] : memref<4x8x1xf32, #tpu.memory_space<vmem>>, vector<1x8x1xf32>
    %41 = vector.shape_cast %40 : vector<1x8x1xf32> to vector<8x1xf32>
    %42 = vector.shape_cast %18 : vector<8x1xf32> to vector<1x8x1xf32>
    tpu.vector_store %arg7[%c0_26, %c0_27, %c0_28], %42 {strides = array<i32>} : memref<4x8x1xf32, #tpu.memory_space<vmem>>, vector<1x8x1xf32>,
    %43 = vector.extract_strided_slice %6 {offsets = [0, 8], sizes = [8, 8], strides = [1, 1]} : vector<8x32xf32> to vector<8x8xf32>
    %44 = vector.extract_strided_slice %8 {offsets = [0, 8], sizes = [8, 8], strides = [1, 1]} : vector<8x32xf32> to vector<8x8xf32>
    %cst_29 = arith.constant dense<0.000000e+00> : vector<8x8xf32>
    %45 = tpu.matmul %43, %44, %cst_29 {dimension_numbers = #tpu.dot_dimension_numbers<[1], [1], [0], [0], [0, 0, 1, 0], [], []>} : vector<8x8xf32>, vector<8x8xf32>, vector<8x8xf32> -> vector<8x8xf32>
    %c1 = arith.constant 1 : index
    %c0_30 = arith.constant 0 : index
    %c0_31 = arith.constant 0 : index
    %46 = vector.load %arg7[%c1, %c0_30, %c0_31] : memref<4x8x1xf32, #tpu.memory_space<vmem>>, vector<1x8x1xf32>
    %47 = vector.shape_cast %46 : vector<1x8x1xf32> to vector<8x1xf32>
    %cst_32 = arith.constant dense<0xFF800000> : vector<8xf32>
    %48 = vector.multi_reduction <maximumf>, %45, %cst_32 [1] : vector<8x8xf32> to vector<8xf32>
    %49 = vector.shape_cast %48 : vector<8xf32> to vector<8x1xf32>
    %50 = arith.maximumf %47, %49 : vector<8x1xf32>
    %51 = arith.subf %47, %50 : vector<8x1xf32>
    %52 = math.exp2 %51 : vector<8x1xf32>
    %53 = vector.broadcast %50 : vector<8x1xf32> to vector<8x8xf32>
    %54 = arith.subf %45, %53 : vector<8x8xf32>
    %55 = math.exp2 %54 : vector<8x8xf32>
    %c1_33 = arith.constant 1 : index
    %c0_34 = arith.constant 0 : index
    %c0_35 = arith.constant 0 : index
    %56 = vector.load %arg8[%c1_33, %c0_34, %c0_35] : memref<4x8x1xf32, #tpu.memory_space<vmem>>, vector<1x8x1xf32>
    %57 = vector.shape_cast %56 : vector<1x8x1xf32> to vector<8x1xf32>
    %58 = arith.mulf %52, %57 : vector<8x1xf32>
    %cst_36 = arith.constant dense<0.000000e+00> : vector<8xf32>
    %59 = vector.multi_reduction <add>, %55, %cst_36 [1] : vector<8x8xf32> to vector<8xf32>
    %60 = vector.shape_cast %59 : vector<8xf32> to vector<8x1xf32>
    %61 = arith.addf %58, %60 : vector<8x1xf32>
    %c1_37 = arith.constant 1 : index
    %c0_38 = arith.constant 0 : index
    %c0_39 = arith.constant 0 : index
    %62 = vector.load %arg8[%c1_37, %c0_38, %c0_39] : memref<4x8x1xf32, #tpu.memory_space<vmem>>, vector<1x8x1xf32>
    %63 = vector.shape_cast %62 : vector<1x8x1xf32> to vector<8x1xf32>
    %64 = vector.shape_cast %61 : vector<8x1xf32> to vector<1x8x1xf32>
    tpu.vector_store %arg8[%c1_37, %c0_38, %c0_39], %64 {strides = array<i32>} : memref<4x8x1xf32, #tpu.memory_space<vmem>>, vector<1x8x1xf32>,
    %c0_40 = arith.constant 0 : index
    %c8 = arith.constant 8 : index
    %65 = vector.load %arg9[%c0_40, %c8] : memref<8x32xf32, #tpu.memory_space<vmem>>, vector<8x8xf32>
    %66 = vector.broadcast %52 : vector<8x1xf32> to vector<8x8xf32>
    %67 = arith.mulf %66, %65 : vector<8x8xf32>
    %68 = vector.extract_strided_slice %10 {offsets = [0, 8], sizes = [8, 8], strides = [1, 1]} : vector<8x32xf32> to vector<8x8xf32>
    %cst_41 = arith.constant dense<0.000000e+00> : vector<8x8xf32>
    %69 = tpu.matmul %55, %68, %cst_41 {dimension_numbers = #tpu.dot_dimension_numbers<[1], [0], [0], [1], [0, 0, 1, 1], [], []>} : vector<8x8xf32>, vector<8x8xf32>, vector<8x8xf32> -> vector<8x8xf32>
    %70 = arith.addf %67, %69 : vector<8x8xf32>
    %c0_42 = arith.constant 0 : index
    %c8_43 = arith.constant 8 : index
    %71 = vector.load %arg9[%c0_42, %c8_43] : memref<8x32xf32, #tpu.memory_space<vmem>>, vector<8x8xf32>
    tpu.vector_store %arg9[%c0_42, %c8_43], %70 {strides = array<i32>} : memref<8x32xf32, #tpu.memory_space<vmem>>, vector<8x8xf32>,
    %c1_44 = arith.constant 1 : index
    %c0_45 = arith.constant 0 : index
    %c0_46 = arith.constant 0 : index
    %72 = vector.load %arg7[%c1_44, %c0_45, %c0_46] : memref<4x8x1xf32, #tpu.memory_space<vmem>>, vector<1x8x1xf32>
    %73 = vector.shape_cast %72 : vector<1x8x1xf32> to vector<8x1xf32>
    %74 = vector.shape_cast %50 : vector<8x1xf32> to vector<1x8x1xf32>
    tpu.vector_store %arg7[%c1_44, %c0_45, %c0_46], %74 {strides = array<i32>} : memref<4x8x1xf32, #tpu.memory_space<vmem>>, vector<1x8x1xf32>,
    %75 = vector.extract_strided_slice %6 {offsets = [0, 16], sizes = [8, 8], strides = [1, 1]} : vector<8x32xf32> to vector<8x8xf32>
    %76 = vector.extract_strided_slice %8 {offsets = [0, 16], sizes = [8, 8], strides = [1, 1]} : vector<8x32xf32> to vector<8x8xf32>
    %cst_47 = arith.constant dense<0.000000e+00> : vector<8x8xf32>
    %77 = tpu.matmul %75, %76, %cst_47 {dimension_numbers = #tpu.dot_dimension_numbers<[1], [1], [0], [0], [0, 0, 1, 0], [], []>} : vector<8x8xf32>, vector<8x8xf32>, vector<8x8xf32> -> vector<8x8xf32>
    %c2 = arith.constant 2 : index
    %c0_48 = arith.constant 0 : index
    %c0_49 = arith.constant 0 : index
    %78 = vector.load %arg7[%c2, %c0_48, %c0_49] : memref<4x8x1xf32, #tpu.memory_space<vmem>>, vector<1x8x1xf32>
    %79 = vector.shape_cast %78 : vector<1x8x1xf32> to vector<8x1xf32>
    %cst_50 = arith.constant dense<0xFF800000> : vector<8xf32>
    %80 = vector.multi_reduction <maximumf>, %77, %cst_50 [1] : vector<8x8xf32> to vector<8xf32>
    %81 = vector.shape_cast %80 : vector<8xf32> to vector<8x1xf32>
    %82 = arith.maximumf %79, %81 : vector<8x1xf32>
    %83 = arith.subf %79, %82 : vector<8x1xf32>
    %84 = math.exp2 %83 : vector<8x1xf32>
    %85 = vector.broadcast %82 : vector<8x1xf32> to vector<8x8xf32>
    %86 = arith.subf %77, %85 : vector<8x8xf32>
    %87 = math.exp2 %86 : vector<8x8xf32>
    %c2_51 = arith.constant 2 : index
    %c0_52 = arith.constant 0 : index
    %c0_53 = arith.constant 0 : index
    %88 = vector.load %arg8[%c2_51, %c0_52, %c0_53] : memref<4x8x1xf32, #tpu.memory_space<vmem>>, vector<1x8x1xf32>
    %89 = vector.shape_cast %88 : vector<1x8x1xf32> to vector<8x1xf32>
    %90 = arith.mulf %84, %89 : vector<8x1xf32>
    %cst_54 = arith.constant dense<0.000000e+00> : vector<8xf32>
    %91 = vector.multi_reduction <add>, %87, %cst_54 [1] : vector<8x8xf32> to vector<8xf32>
    %92 = vector.shape_cast %91 : vector<8xf32> to vector<8x1xf32>
    %93 = arith.addf %90, %92 : vector<8x1xf32>
    %c2_55 = arith.constant 2 : index
    %c0_56 = arith.constant 0 : index
    %c0_57 = arith.constant 0 : index
    %94 = vector.load %arg8[%c2_55, %c0_56, %c0_57] : memref<4x8x1xf32, #tpu.memory_space<vmem>>, vector<1x8x1xf32>
    %95 = vector.shape_cast %94 : vector<1x8x1xf32> to vector<8x1xf32>
    %96 = vector.shape_cast %93 : vector<8x1xf32> to vector<1x8x1xf32>
    tpu.vector_store %arg8[%c2_55, %c0_56, %c0_57], %96 {strides = array<i32>} : memref<4x8x1xf32, #tpu.memory_space<vmem>>, vector<1x8x1xf32>,
    %c0_58 = arith.constant 0 : index
    %c16 = arith.constant 16 : index
    %97 = vector.load %arg9[%c0_58, %c16] : memref<8x32xf32, #tpu.memory_space<vmem>>, vector<8x8xf32>
    %98 = vector.broadcast %84 : vector<8x1xf32> to vector<8x8xf32>
    %99 = arith.mulf %98, %97 : vector<8x8xf32>
    %100 = vector.extract_strided_slice %10 {offsets = [0, 16], sizes = [8, 8], strides = [1, 1]} : vector<8x32xf32> to vector<8x8xf32>
    %cst_59 = arith.constant dense<0.000000e+00> : vector<8x8xf32>
    %101 = tpu.matmul %87, %100, %cst_59 {dimension_numbers = #tpu.dot_dimension_numbers<[1], [0], [0], [1], [0, 0, 1, 1], [], []>} : vector<8x8xf32>, vector<8x8xf32>, vector<8x8xf32> -> vector<8x8xf32>
    %102 = arith.addf %99, %101 : vector<8x8xf32>
    %c0_60 = arith.constant 0 : index
    %c16_61 = arith.constant 16 : index
    %103 = vector.load %arg9[%c0_60, %c16_61] : memref<8x32xf32, #tpu.memory_space<vmem>>, vector<8x8xf32>
    tpu.vector_store %arg9[%c0_60, %c16_61], %102 {strides = array<i32>} : memref<8x32xf32, #tpu.memory_space<vmem>>, vector<8x8xf32>,
    %c2_62 = arith.constant 2 : index
    %c0_63 = arith.constant 0 : index
    %c0_64 = arith.constant 0 : index
    %104 = vector.load %arg7[%c2_62, %c0_63, %c0_64] : memref<4x8x1xf32, #tpu.memory_space<vmem>>, vector<1x8x1xf32>
    %105 = vector.shape_cast %104 : vector<1x8x1xf32> to vector<8x1xf32>
    %106 = vector.shape_cast %82 : vector<8x1xf32> to vector<1x8x1xf32>
    tpu.vector_store %arg7[%c2_62, %c0_63, %c0_64], %106 {strides = array<i32>} : memref<4x8x1xf32, #tpu.memory_space<vmem>>, vector<1x8x1xf32>,
    %107 = vector.extract_strided_slice %6 {offsets = [0, 24], sizes = [8, 8], strides = [1, 1]} : vector<8x32xf32> to vector<8x8xf32>
    %108 = vector.extract_strided_slice %8 {offsets = [0, 24], sizes = [8, 8], strides = [1, 1]} : vector<8x32xf32> to vector<8x8xf32>
    %cst_65 = arith.constant dense<0.000000e+00> : vector<8x8xf32>
    %109 = tpu.matmul %107, %108, %cst_65 {dimension_numbers = #tpu.dot_dimension_numbers<[1], [1], [0], [0], [0, 0, 1, 0], [], []>} : vector<8x8xf32>, vector<8x8xf32>, vector<8x8xf32> -> vector<8x8xf32>
    %c3 = arith.constant 3 : index
    %c0_66 = arith.constant 0 : index
    %c0_67 = arith.constant 0 : index
    %110 = vector.load %arg7[%c3, %c0_66, %c0_67] : memref<4x8x1xf32, #tpu.memory_space<vmem>>, vector<1x8x1xf32>
    %111 = vector.shape_cast %110 : vector<1x8x1xf32> to vector<8x1xf32>
    %cst_68 = arith.constant dense<0xFF800000> : vector<8xf32>
    %112 = vector.multi_reduction <maximumf>, %109, %cst_68 [1] : vector<8x8xf32> to vector<8xf32>
    %113 = vector.shape_cast %112 : vector<8xf32> to vector<8x1xf32>
    %114 = arith.maximumf %111, %113 : vector<8x1xf32>
    %115 = arith.subf %111, %114 : vector<8x1xf32>
    %116 = math.exp2 %115 : vector<8x1xf32>
    %117 = vector.broadcast %114 : vector<8x1xf32> to vector<8x8xf32>
    %118 = arith.subf %109, %117 : vector<8x8xf32>
    %119 = math.exp2 %118 : vector<8x8xf32>
    %c3_69 = arith.constant 3 : index
    %c0_70 = arith.constant 0 : index
    %c0_71 = arith.constant 0 : index
    %120 = vector.load %arg8[%c3_69, %c0_70, %c0_71] : memref<4x8x1xf32, #tpu.memory_space<vmem>>, vector<1x8x1xf32>
    %121 = vector.shape_cast %120 : vector<1x8x1xf32> to vector<8x1xf32>
    %122 = arith.mulf %116, %121 : vector<8x1xf32>
    %cst_72 = arith.constant dense<0.000000e+00> : vector<8xf32>
    %123 = vector.multi_reduction <add>, %119, %cst_72 [1] : vector<8x8xf32> to vector<8xf32>
    %124 = vector.shape_cast %123 : vector<8xf32> to vector<8x1xf32>
    %125 = arith.addf %122, %124 : vector<8x1xf32>
    %c3_73 = arith.constant 3 : index
    %c0_74 = arith.constant 0 : index
    %c0_75 = arith.constant 0 : index
    %126 = vector.load %arg8[%c3_73, %c0_74, %c0_75] : memref<4x8x1xf32, #tpu.memory_space<vmem>>, vector<1x8x1xf32>
    %127 = vector.shape_cast %126 : vector<1x8x1xf32> to vector<8x1xf32>
    %128 = vector.shape_cast %125 : vector<8x1xf32> to vector<1x8x1xf32>
    tpu.vector_store %arg8[%c3_73, %c0_74, %c0_75], %128 {strides = array<i32>} : memref<4x8x1xf32, #tpu.memory_space<vmem>>, vector<1x8x1xf32>,
    %c0_76 = arith.constant 0 : index
    %c24 = arith.constant 24 : index
    %129 = vector.load %arg9[%c0_76, %c24] : memref<8x32xf32, #tpu.memory_space<vmem>>, vector<8x8xf32>
    %130 = vector.broadcast %116 : vector<8x1xf32> to vector<8x8xf32>
    %131 = arith.mulf %130, %129 : vector<8x8xf32>
    %132 = vector.extract_strided_slice %10 {offsets = [0, 24], sizes = [8, 8], strides = [1, 1]} : vector<8x32xf32> to vector<8x8xf32>
    %cst_77 = arith.constant dense<0.000000e+00> : vector<8x8xf32>
    %133 = tpu.matmul %119, %132, %cst_77 {dimension_numbers = #tpu.dot_dimension_numbers<[1], [0], [0], [1], [0, 0, 1, 1], [], []>} : vector<8x8xf32>, vector<8x8xf32>, vector<8x8xf32> -> vector<8x8xf32>
    %134 = arith.addf %131, %133 : vector<8x8xf32>
    %c0_78 = arith.constant 0 : index
    %c24_79 = arith.constant 24 : index
    %135 = vector.load %arg9[%c0_78, %c24_79] : memref<8x32xf32, #tpu.memory_space<vmem>>, vector<8x8xf32>
    tpu.vector_store %arg9[%c0_78, %c24_79], %134 {strides = array<i32>} : memref<8x32xf32, #tpu.memory_space<vmem>>, vector<8x8xf32>,
    %c3_80 = arith.constant 3 : index
    %c0_81 = arith.constant 0 : index
    %c0_82 = arith.constant 0 : index
    %136 = vector.load %arg7[%c3_80, %c0_81, %c0_82] : memref<4x8x1xf32, #tpu.memory_space<vmem>>, vector<1x8x1xf32>
    %137 = vector.shape_cast %136 : vector<1x8x1xf32> to vector<8x1xf32>
    %138 = vector.shape_cast %114 : vector<8x1xf32> to vector<1x8x1xf32>
    tpu.vector_store %arg7[%c3_80, %c0_81, %c0_82], %138 {strides = array<i32>} : memref<4x8x1xf32, #tpu.memory_space<vmem>>, vector<1x8x1xf32>,
    %c0_i32_83 = arith.constant 0 : i32
    %139 = arith.cmpi eq, %arg2, %c0_i32_83 : i32
    %140 = arith.extui %139 : i1 to i32
    %c0_i32_84 = arith.constant 0 : i32
    %141 = arith.cmpi ne, %140, %c0_i32_84 : i32
    scf.if %141 {
      %c0_85 = arith.constant 0 : index
      %c0_86 = arith.constant 0 : index
      %c0_87 = arith.constant 0 : index
      %142 = vector.load %arg8[%c0_85, %c0_86, %c0_87] : memref<4x8x1xf32, #tpu.memory_space<vmem>>, vector<1x8x1xf32>
      %143 = vector.shape_cast %142 : vector<1x8x1xf32> to vector<8x1xf32>
      %144 = tpu.reciprocal %143 {approx = true} : vector<8x1xf32> -> vector<8x1xf32>
      %145 = arith.mulf %143, %144 : vector<8x1xf32>
      %cst_88 = arith.constant 2.000000e+00 : f32
      %146 = vector.broadcast %cst_88 : f32 to vector<8x1xf32>
      %147 = arith.subf %146, %145 : vector<8x1xf32>
      %148 = arith.mulf %144, %147 : vector<8x1xf32>
      %c0_89 = arith.constant 0 : index
      %c0_90 = arith.constant 0 : index
      %149 = vector.load %arg9[%c0_89, %c0_90] : memref<8x32xf32, #tpu.memory_space<vmem>>, vector<8x8xf32>
      %150 = vector.broadcast %148 : vector<8x1xf32> to vector<8x8xf32>
      %151 = arith.mulf %149, %150 : vector<8x8xf32>
      %c0_91 = arith.constant 0 : index
      %c0_92 = arith.constant 0 : index
      %c0_93 = arith.constant 0 : index
      %152 = vector.load %arg6[%c0_91, %c0_92, %c0_93] : memref<1x8x32xf32, #tpu.memory_space<vmem>>, vector<1x8x8xf32>
      %153 = vector.shape_cast %152 : vector<1x8x8xf32> to vector<8x8xf32>
      %154 = vector.shape_cast %151 : vector<8x8xf32> to vector<1x8x8xf32>
      tpu.vector_store %arg6[%c0_91, %c0_92, %c0_93], %154 {strides = array<i32>} : memref<1x8x32xf32, #tpu.memory_space<vmem>>, vector<1x8x8xf32>,
      %c1_94 = arith.constant 1 : index
      %c0_95 = arith.constant 0 : index
      %c0_96 = arith.constant 0 : index
      %155 = vector.load %arg8[%c1_94, %c0_95, %c0_96] : memref<4x8x1xf32, #tpu.memory_space<vmem>>, vector<1x8x1xf32>
      %156 = vector.shape_cast %155 : vector<1x8x1xf32> to vector<8x1xf32>
      %157 = tpu.reciprocal %156 {approx = true} : vector<8x1xf32> -> vector<8x1xf32>
      %158 = arith.mulf %156, %157 : vector<8x1xf32>
      %cst_97 = arith.constant 2.000000e+00 : f32
      %159 = vector.broadcast %cst_97 : f32 to vector<8x1xf32>
      %160 = arith.subf %159, %158 : vector<8x1xf32>
      %161 = arith.mulf %157, %160 : vector<8x1xf32>
      %c0_98 = arith.constant 0 : index
      %c8_99 = arith.constant 8 : index
      %162 = vector.load %arg9[%c0_98, %c8_99] : memref<8x32xf32, #tpu.memory_space<vmem>>, vector<8x8xf32>
      %163 = vector.broadcast %161 : vector<8x1xf32> to vector<8x8xf32>
      %164 = arith.mulf %162, %163 : vector<8x8xf32>
      %c0_100 = arith.constant 0 : index
      %c0_101 = arith.constant 0 : index
      %c8_102 = arith.constant 8 : index
      %165 = vector.load %arg6[%c0_100, %c0_101, %c8_102] : memref<1x8x32xf32, #tpu.memory_space<vmem>>, vector<1x8x8xf32>
      %166 = vector.shape_cast %165 : vector<1x8x8xf32> to vector<8x8xf32>
      %167 = vector.shape_cast %164 : vector<8x8xf32> to vector<1x8x8xf32>
      tpu.vector_store %arg6[%c0_100, %c0_101, %c8_102], %167 {strides = array<i32>} : memref<1x8x32xf32, #tpu.memory_space<vmem>>, vector<1x8x8xf32>,
      %c2_103 = arith.constant 2 : index
      %c0_104 = arith.constant 0 : index
      %c0_105 = arith.constant 0 : index
      %168 = vector.load %arg8[%c2_103, %c0_104, %c0_105] : memref<4x8x1xf32, #tpu.memory_space<vmem>>, vector<1x8x1xf32>
      %169 = vector.shape_cast %168 : vector<1x8x1xf32> to vector<8x1xf32>
      %170 = tpu.reciprocal %169 {approx = true} : vector<8x1xf32> -> vector<8x1xf32>
      %171 = arith.mulf %169, %170 : vector<8x1xf32>
      %cst_106 = arith.constant 2.000000e+00 : f32
      %172 = vector.broadcast %cst_106 : f32 to vector<8x1xf32>
      %173 = arith.subf %172, %171 : vector<8x1xf32>
      %174 = arith.mulf %170, %173 : vector<8x1xf32>
      %c0_107 = arith.constant 0 : index
      %c16_108 = arith.constant 16 : index
      %175 = vector.load %arg9[%c0_107, %c16_108] : memref<8x32xf32, #tpu.memory_space<vmem>>, vector<8x8xf32>
      %176 = vector.broadcast %174 : vector<8x1xf32> to vector<8x8xf32>
      %177 = arith.mulf %175, %176 : vector<8x8xf32>
      %c0_109 = arith.constant 0 : index
      %c0_110 = arith.constant 0 : index
      %c16_111 = arith.constant 16 : index
      %178 = vector.load %arg6[%c0_109, %c0_110, %c16_111] : memref<1x8x32xf32, #tpu.memory_space<vmem>>, vector<1x8x8xf32>
      %179 = vector.shape_cast %178 : vector<1x8x8xf32> to vector<8x8xf32>
      %180 = vector.shape_cast %177 : vector<8x8xf32> to vector<1x8x8xf32>
      tpu.vector_store %arg6[%c0_109, %c0_110, %c16_111], %180 {strides = array<i32>} : memref<1x8x32xf32, #tpu.memory_space<vmem>>, vector<1x8x8xf32>,
      %c3_112 = arith.constant 3 : index
      %c0_113 = arith.constant 0 : index
      %c0_114 = arith.constant 0 : index
      %181 = vector.load %arg8[%c3_112, %c0_113, %c0_114] : memref<4x8x1xf32, #tpu.memory_space<vmem>>, vector<1x8x1xf32>
      %182 = vector.shape_cast %181 : vector<1x8x1xf32> to vector<8x1xf32>
      %183 = tpu.reciprocal %182 {approx = true} : vector<8x1xf32> -> vector<8x1xf32>
      %184 = arith.mulf %182, %183 : vector<8x1xf32>
      %cst_115 = arith.constant 2.000000e+00 : f32
      %185 = vector.broadcast %cst_115 : f32 to vector<8x1xf32>
      %186 = arith.subf %185, %184 : vector<8x1xf32>
      %187 = arith.mulf %183, %186 : vector<8x1xf32>
      %c0_116 = arith.constant 0 : index
      %c24_117 = arith.constant 24 : index
      %188 = vector.load %arg9[%c0_116, %c24_117] : memref<8x32xf32, #tpu.memory_space<vmem>>, vector<8x8xf32>
      %189 = vector.broadcast %187 : vector<8x1xf32> to vector<8x8xf32>
      %190 = arith.mulf %188, %189 : vector<8x8xf32>
      %c0_118 = arith.constant 0 : index
      %c0_119 = arith.constant 0 : index
      %c24_120 = arith.constant 24 : index
      %191 = vector.load %arg6[%c0_118, %c0_119, %c24_120] : memref<1x8x32xf32, #tpu.memory_space<vmem>>, vector<1x8x8xf32>
      %192 = vector.shape_cast %191 : vector<1x8x8xf32> to vector<8x8xf32>
      %193 = vector.shape_cast %190 : vector<8x8xf32> to vector<1x8x8xf32>
      tpu.vector_store %arg6[%c0_118, %c0_119, %c24_120], %193 {strides = array<i32>} : memref<1x8x32xf32, #tpu.memory_space<vmem>>, vector<1x8x8xf32>,
    } else {
    }
    return
  }
  func.func @transform_0(%arg0: i32, %arg1: i32, %arg2: i32) -> (i32, i32, i32) {
    %c0_i32 = arith.constant 0 : i32
    %c0_i32_0 = arith.constant 0 : i32
    return %arg0, %arg1, %c0_i32 : i32, i32, i32
  }
  func.func @transform_1(%arg0: i32, %arg1: i32, %arg2: i32) -> (i32, i32, i32) {
    %c0_i32 = arith.constant 0 : i32
    %c0_i32_0 = arith.constant 0 : i32
    return %arg0, %arg2, %c0_i32 : i32, i32, i32
  }
  func.func @transform_2(%arg0: i32, %arg1: i32, %arg2: i32) -> (i32, i32, i32) {
    %c0_i32 = arith.constant 0 : i32
    %c0_i32_0 = arith.constant 0 : i32
    return %arg0, %arg2, %c0_i32 : i32, i32, i32
  }
  func.func @transform_3(%arg0: i32, %arg1: i32, %arg2: i32) -> (i32, i32, i32) {
    %c0_i32 = arith.constant 0 : i32
    %c0_i32_0 = arith.constant 0 : i32
    return %arg0, %arg1, %c0_i32 : i32, i32, i32
  }
}

</mosaic_0001>

<bundles_post_ra>
// kernel: tpu_custom_call.1
= control target key start
LH: loop header
LB: loop body
LE: loop exit
PB: predicated region body
PF: predicated region fallthrough
CT: control target
= control target key end

     0   :  { %s1961_s0 = inlined_call_operand.hbm [shape: f32[2,8,32], index: 0, kind: input, shape index: {}]   ;;  %s1962_s1 = inlined_call_operand.hbm [shape: f32[2,8,32], index: 1, kind: input, shape index: {}]   ;;  %s1963_s2 = inlined_call_operand.hbm [shape: f32[2,8,32], index: 2, kind: input, shape index: {}]   ;;  %s1964_s3 = inlined_call_operand.hbm [shape: f32[2,8,32], index: 3, kind: output, shape index: {}]  }
   0x1   :  { %1968 = sst [smem:[#allocation17_spill]] %s1962_s1 }
   0x2   :  { %8 = vsyncpa [#allocation6], 0 }
   0x3   :  { %10 = vsyncpa [#allocation6 + $0x1], 0 }
   0x4   :  { %11 = vsyncpa [#allocation9], 0 }
   0x5   :  { %13 = vsyncpa [#allocation9 + $0x1], 0 }
   0x6   :  { %14 = vsyncpa [#allocation7], 0 }
   0x7   :  { %16 = vsyncpa [#allocation7 + $0x1], 0  ;;  %s1662_s12 = smov 0   ;;  %s1664_s13 = smov 0  }
   0x8   :  { %s1666_s14 = smov 0   ;;  %s1668_s15 = smov 0  }
   0x9   :  { %s1670_s16 = smov 0   ;;  %s1672_s17 = smov 0  }
   0xa LB: > { %1969 = sst [smem:[#allocation15_spill]] %s1622_s16  ;;  %s1693_s18 = sadd.s32 4294967295, %s1626_s17   ;;  %s1626_s17 = sphi %s1672_s17, %s22_s17   ;;  %s1622_s16 = sphi %s1670_s16, %s1981_s16   ;;  %s1618_s15 = sphi %s1668_s15, %s1980_s15   ;;  %s1614_s14 = sphi %s1666_s14, %s1984_s14   ;;  %s1610_s13 = sphi %s1664_s13, %s1983_s13   ;;  %s1606_s12 = sphi %s1662_s12, %s1982_s12  }
   0xb   : > { %s1264_s19 = sadd.s32 4294967294, %s1626_s17   ;;  %s41_s20 = sadd.s32 1, %s1622_s16 }
   0xc   : > { %s50_s21 = sadd.s32 1, %s1614_s14  ;;  %p43_p0 = scmp.ge.s32.totalorder %s41_s20, 2 }
   0xd   : > { %p57_p1 = scmp.ne.s32.totalorder %s1614_s14, %s1610_s13  ;;  %p58_p2 = scmp.eq.s32.totalorder %s1626_s17, 0 }
   0xe   : > { %p63_p3 = scmp.ne.s32.totalorder %s1610_s13, %s1606_s12  ;;  %s1986_s20 = smov (%p43_p0, %s41_s20), 0 }
   0xf   : > { %1970 = sst [smem:[#allocation16_spill]] %s1986_s20  ;;  %p1705_p4 = por %p58_p2, %p57_p1 }
  0x10   : > { %p64_p5 = scmp.eq.s32.totalorder %s1693_s18, 0  ;;  %s45_s23 = ssub.s32 %s1622_s16, %s1986_s20 }
  0x11   : > { %p145_p6 = scmp.eq.s32.totalorder %s1693_s18, 1  ;;  %p48_p7 = scmp.eq.s32.totalorder %s45_s23, 0 }
  0x12   : > { %p1713_p8 = por %p64_p5, %p63_p3  ;;  %p151_p10 = scmp.eq.s32.totalorder %s1264_s19, 1 }
  0x13   : > { %p1717_p9 = por %p145_p6, %p57_p1  ;;  %p1372_p13 = scmp.lt.s32.totalorder %s1626_s17, 2 }
  0x14   : > { %s1722_s26 = scalar_select %p48_p7, %s1614_s14, %s50_s21  }
  0x15   : > { %p1724_p11 = por %p151_p10, %p63_p3  ;;  %s1965_s28 = sand.u32 1, %s1614_s14  }
  0x16   : > { %s1733_s29 = sshll.u32 %s1965_s28, 3  ;;  %s1736_s30 = sshll.u32 %s1622_s16, 7 }
  0x17   : > { %p1740_p0 = pnand %p1372_p13, %p1705_p4  ;;  %s190_s5 = sand.u32 1, %s1626_s17  }
  0x18   : > { %s1976_s1 = sld [smem:[#allocation17_spill]]  ;;  %s194_s9 = scalar_lea.vmem [#allocation8], %s1733_s29 }
  0x19   : > { %s202_s10 = sshll.u32 %s194_s9, 4  ;;  %p1273_p1 = scmp.ge.s32.totalorder %s1626_s17, 1  ;;  %s203_s10 = int_to_ptr.vmem [resolvable:$true] %s202_s10 }
  0x1a   : > { %p226_p2 = scmp.lt.s32.totalorder %s1626_s17, 3  ;;  %s1752_s11 = scalar_lea.sflag [#allocation9], %s190_s5 }
  0x1b   : > { %p1460_p3 = pneg %p1740_p0  ;;  %s1471_s19 = scalar_lea.vmem %s203_s10, 128 }
  0x1c   : > { %p1472_p4 = scmp.ne.s32.totalorder %s203_s10, %s1471_s19  ;;  %s1628_s21 = smov [#allocation8]  }
  0x1d   : > { %s1476_s22 = sshll.u32 %s1628_s21, 4  ;;  %s1477_s22 = int_to_ptr.vmem [resolvable:$false] %s1476_s22 }
  0x1e   : > { %s200_s8 = scalar_lea.hbm %s1976_s1, %s1736_s30  ;;  %p1474_p5 = pnand %p1472_p4, %p1460_p3 }
  0x1f   : > { %s1478_s23 = scalar_lea.vmem %s1477_s22, 256  ;;  %p1479_p7 = scmp.lt.s32.totalorder %s203_s10, %s1477_s22 }
  0x20   : > { %p1475_p6 = pneg %p1474_p5  ;;  %p1480_p10 = scmp.lt.s32.totalorder %s1478_s23, %s1471_s19 }
  0x22   : > { %p1481_p13 = por %p1480_p10, %p1479_p7 }
  0x24   : > { %p1482_p12 = pnand %p1481_p13, %p1475_p6 }
  0x26   : > { %1485 = shalt.err (!%p1482_p12)
}
  0x27   : > { %1364 = dma.hbm_to_vmem [thread:$0]  (!%p1740_p0), %s200_s8, 128, %s203_s10, %s1752_s11  }
  0x28   : > { %p1766_p4 = pnand %p1273_p1, %p226_p2  ;;  %s181_s9 = scalar_lea.hbm %s1961_s0, %s1736_s30 }
  0x29   : > { %s175_s19 = scalar_lea.vmem [#allocation5], %s1733_s29  ;;  %s219_s28 = scalar_lea.hbm %s1963_s2, %s1736_s30 }
  0x2a   : > { %s183_s21 = sshll.u32 %s175_s19, 4  ;;  %s1978_s1 = sand.u32 1, %s1614_s14   ;;  %s184_s21 = int_to_ptr.vmem [resolvable:$true] %s183_s21 }
  0x2b   : > { %s172_s20 = scalar_lea.sflag [#allocation6], %s1978_s1  ;;  %s1499_s8 = scalar_lea.vmem %s184_s21, 128 }
  0x2c   : > { %p1500_p12 = scmp.ne.s32.totalorder %s184_s21, %s1499_s8  ;;  %s1629_s10 = smov [#allocation5]  }
  0x2d   : > { %s1504_s16 = sshll.u32 %s1629_s10, 4  ;;  %s1505_s16 = int_to_ptr.vmem [resolvable:$false] %s1504_s16 }
  0x2e   : > { %p1502_p1 = pnand %p1500_p12, %p1460_p3  ;;  %s1506_s6 = scalar_lea.vmem %s1505_s16, 256 }
  0x2f   : > { %p1507_p5 = scmp.lt.s32.totalorder %s184_s21, %s1505_s16  ;;  %p1508_p6 = scmp.lt.s32.totalorder %s1506_s6, %s1499_s8 }
  0x30   : > { %p1503_p2 = pneg %p1502_p1 }
  0x31   : > { %p1509_p7 = por %p1508_p6, %p1507_p5 }
  0x33   : > { %p1510_p10 = pnand %p1509_p7, %p1503_p2 }
  0x35   : > { %1513 = shalt.err (!%p1510_p10)
}
  0x36   : > { %1361 = dma.hbm_to_vmem [thread:$0]  (!%p1740_p0), %s181_s9, 128, %s184_s21, %s172_s20  }
  0x37   : > { %s213_s1 = scalar_lea.vmem [#allocation10], %s1733_s29  ;;  %s1630_s22 = smov [#allocation10]  }
  0x38   : > { %s221_s7 = sshll.u32 %s213_s1, 4  ;;  %s1532_s16 = sshll.u32 %s1630_s22, 4  ;;  %s222_s7 = int_to_ptr.vmem [resolvable:$true] %s221_s7  ;;  %s1533_s16 = int_to_ptr.vmem [resolvable:$false] %s1532_s16 }
  0x39   : > { %s1527_s19 = scalar_lea.vmem %s222_s7, 128  ;;  %s1534_s23 = scalar_lea.vmem %s1533_s16, 256 }
  0x3a   : > { %p1528_p13 = scmp.ne.s32.totalorder %s222_s7, %s1527_s19  ;;  %p1535_p2 = scmp.lt.s32.totalorder %s222_s7, %s1533_s16 }
  0x3b   : > { %p1536_p5 = scmp.lt.s32.totalorder %s1534_s23, %s1527_s19 }
  0x3c   : > { %p1530_p12 = pnand %p1528_p13, %p1460_p3 }
  0x3d   : > { %p1537_p6 = por %p1536_p5, %p1535_p2 }
  0x3e   : > { %p1531_p1 = pneg %p1530_p12 }
  0x40   : > { %p1538_p7 = pnand %p1537_p6, %p1531_p1 }
  0x42   : > { %1541 = shalt.err (!%p1538_p7)
}
  0x43   : > { %1367 = dma.hbm_to_vmem [thread:$0]  (!%p1740_p0), %s219_s28, 128, %s222_s7, %s1752_s11  }
  0x44   : > { %230 = sbr.rel (%p1766_p4) target bundleno = 1395 (0x573), region = 32  ;;  %s1801_s9 = sand.u32 (!%p1766_p4), 1, %s1610_s13  }
  0x45   : > { %s1804_s21 = sshll.u32 (!%p1766_p4), %s1801_s9, 3  ;;  %s233_s4 = scalar_lea.sflag (!%p1766_p4), [#allocation6], %s1801_s9 }
  0x46   : > { %s236_s8 = scalar_lea.vmem (!%p1766_p4), [#allocation5], %s1804_s21 }
  0x49   : > { %1593 = dma.done.wait (%p1713_p8), %s233_s4, 128  }
  0x4a   : > { %1595 = vsyncadd (%p1713_p8), %s233_s4, 4294967168  ;;  %s241_s28 = sand.u32 1, %s1693_s18   ;;  %s245_s11 = scalar_lea.vmem [#allocation8], %s1804_s21 }
  0x4b   : > { %s242_s30 = scalar_lea.sflag [#allocation9], %s241_s28 }
  0x4c   : > { %1597 = dma.done.wait (%p1713_p8), %s242_s30, 256  }
  0x4d   : > { %1599 = vsyncadd (%p1713_p8), %s242_s30, 4294967040  ;;  %v1631_v0 = vmov 0.0   ;;  %vm1632_vm0 = vmmov 0   ;;  %vm306_vm1 = vcmask 64512   ;;  %v304_v1 = vld [vmem:[%s245_s11] sm:$0xff]  ;;  %v302_v2 = vld [vmem:[%s236_s8] sm:$0xff] }
  0x4e   : > { %1310 = vmatprep.subr.mxu0 %v1631_v0  ;;  %1312 = vmatprep.mubr.msk.f32.mxu0 %vm1632_vm0, %v1631_v0  ;;  %v303_v3 = vmul.f32 0.5100697, %v302_v2  ;;  %vm291_vm2 = vcmask 7168   ;;  %v1633_v4 = vmov -1e+30   ;;  %v1634_v8 = vmov 0  }
  0x4f   : > { %1315 = vmatprep.subr.mxu1 %v1631_v0  ;;  %1317 = vmatprep.mubr.msk.f32.mxu1 %vm1632_vm0, %v1631_v0  ;;  %292 = vst.msk [vmem:[#allocation2] sm:$0xff] %vm291_vm2, %v1633_v4  ;;  %293 = vst.msk [vmem:[#allocation2 + $0x8] sm:$0xff] %vm291_vm2, %v1633_v4  ;;  %s1635_s18 = smov 120   ;;  %s1636_s24 = smov 112   ;;  %vm300_vm3 = vcmask 261120   ;;  %vm678_vm4 = vcmask 130112  }
  0x50   : > { %1311 = vmatpush3.xpose.msk.msra.mxu0 %vm306_vm1, %v304_v1  ;;  %294 = vst.msk [vmem:[#allocation2 + $0x10] sm:$0xff] %vm291_vm2, %v1633_v4  ;;  %295 = vst.msk [vmem:[#allocation2 + $0x18] sm:$0xff] %vm291_vm2, %v1633_v4  ;;  %1432 = vset.pattern.permute.xlu0 %v1634_v8  ;;  %s1637_s5 = smov 104   ;;  %s254_s10 = scalar_lea.vmem [#allocation10], %s1804_s21  ;;  %vm870_vm5 = vcmask 195712   ;;  %vm1062_vm6 = vcmask 261312  }
  0x51   : > { %1325 = vmatprep.subr.mxu0 %v1631_v0  ;;  %296 = vst.msk [vmem:[#allocation3] sm:$0xff] %vm291_vm2, %v1631_v0  ;;  %297 = vst.msk [vmem:[#allocation3 + $0x8] sm:$0xff] %vm291_vm2, %v1631_v0  ;;  %1433 = vset.pattern.permute.xlu1 %v1634_v8  ;;  %v1849_v12 = vld [vmem:[%s254_s10] sm:$0xff]  ;;  %s1638_s6 = smov 8   ;;  %s1639_s1 = smov 16  }
  0x52   : > { %298 = vst.msk [vmem:[#allocation3 + $0x10] sm:$0xff] %vm291_vm2, %v1631_v0  ;;  %299 = vst.msk [vmem:[#allocation3 + $0x18] sm:$0xff] %vm291_vm2, %v1631_v0  ;;  %490 = vrot.lane.b32.xlu1 %v304_v1, %s1635_s18  ;;  %1316 = vmatpush3.msra.mxu1 %v1849_v12  ;;  %s1640_s7 = smov 24   ;;  %s1291_s19 = sshll.u32 %s1618_s15, 7 }
  0x53   : > { %1313 = vmatmul.mubr.msk.f32.vlgmr.msra.gmra.mxu0 %vm306_vm1, %v303_v3  ;;  %1320 = vmatprep.subr.mxu1 %v1631_v0  ;;  %301 = vst.msk [vmem:[#allocation4] sm:$0xff] %vm300_vm3, %v1631_v0  ;;  %s286_s22 = scalar_lea.vmem [#allocation11], %s1804_s21  ;;  %s1917_s29 = scalar_lea.hbm %s1964_s3, %s1291_s19 }
  0x54   : > { %1327 = vmatprep.mubr.msk.f32.mxu0 %vm1632_vm0, %v1631_v0  ;;  %s1135_s16 = sshll.u32 %s286_s22, 4  ;;  %s1121_s15 = scalar_lea.sflag [#allocation7], %s1801_s9  ;;  %s1136_s16 = int_to_ptr.vmem [resolvable:$true] %s1135_s16 }
  0x55   : > { %s1542_s21 = scalar_lea.vmem %s1136_s16, 128  ;;  %s1641_s4 = smov [#allocation11]  }
  0x56   : > { %488 = vrot.lane.b32.xlu1 %v303_v3, %s1635_s18  ;;  %v383_v9 = vld [vmem:[#allocation2] sm:$0xff]  ;;  %v567_v34 = vld [vmem:[#allocation2 + $0x8] sm:$0xff]  ;;  %p1543_p8 = scmp.ne.s32.totalorder %s1136_s16, %s1542_s21  ;;  %s1546_s8 = sshll.u32 %s1641_s4, 4  ;;  %s1547_s8 = int_to_ptr.vmem [resolvable:$false] %s1546_s8 }
  0x57   : > { %v760_v37 = vld [vmem:[#allocation2 + $0x10] sm:$0xff]  ;;  %v1876_v40 = vld [vmem:[#allocation2 + $0x18] sm:$0xff]  ;;  %s1548_s28 = scalar_lea.vmem %s1547_s8, 256  ;;  %p1549_p4 = scmp.lt.s32.totalorder %s1136_s16, %s1547_s8 }
  0x58   : > { %p1544_p0 = pnand %p1543_p8, %p1717_p9  ;;  %p1550_p10 = scmp.lt.s32.totalorder %s1548_s28, %s1542_s21 }
  0x5a   : > { %683 = vrot.lane.b32.xlu1 %v304_v1, %s1636_s24  ;;  %v405_v55 = vld [vmem:[#allocation4] sm:$0xff]  ;;  %p1545_p3 = pneg %p1544_p0  ;;  %p1551_p13 = por %p1550_p10, %p1549_p4 }
  0x5c   : > { %p1552_p12 = pnand %p1551_p13, %p1545_p3 }
  0x5e   : > { %681 = vrot.lane.b32.xlu1 %v303_v3, %s1636_s24 }
  0x62   : > { %875 = vrot.lane.b32.xlu1 %v304_v1, %s1637_s5 }
  0x66   : > { %873 = vrot.lane.b32.xlu1 %v303_v3, %s1637_s5 }
  0xc4   : > { %v491_v14 = vpop.permute.xlu1 %490 }
  0xc8   : > { %v489_v17 = vpop.permute.xlu1 %488 }
  0xcc   : > { %v684_v18 = vpop.permute.xlu1 %683 }
  0xd0   : > { %v682_v19 = vpop.permute.xlu1 %681 }
  0xd4   : > { %v876_v21 = vpop.permute.xlu1 %875 }
  0xd8   : > { %v874_v22 = vpop.permute.xlu1 %873 }
 0x113   : > { %v379_v5 = vpop.f32.mrf.mxu0 }
 0x114   : > { %v384_v6 = vsel %vm306_vm1, %v379_v5, -inf }
 0x115   : > { %385 = vmax.xlane.f32.xlu0 %v384_v6  ;;  %v1314_v7 = vpop.f32.mrf.mxu0  ;;  %v397_v6 = vld [vmem:[#allocation3] sm:$0xff] }
 0x19e   : > { %v386_v10 = vpop.xlane.xlu0 %385 }
 0x19f   : > { %v387_v11 = vmax.f32 %v383_v9, %v386_v10  ;;  %v582_v10 = vld [vmem:[#allocation3 + $0x8] sm:$0xff] }
 0x1a1   : > { %v388_v13 = vsub.f32 %v383_v9, %v387_v11  ;;  %487 = vst.msk [vmem:[#allocation2] sm:$0xff] %vm291_vm2, %v387_v11  ;;  %392 = vperm.xlu0 %1432, %v387_v11  }
 0x21c   : > { %v393_v15 = vpop.permute.xlu0 %392 }
 0x21d   : > { %v395_v16 = vsub.f32 %v379_v5, %v393_v15 }
 0x21f   : > { %1434 = vpow2.f32 %v395_v16 }
 0x220   : > { %1436 = vpow2.f32 %v388_v13  ;;  %v775_v13 = vld [vmem:[#allocation3 + $0x10] sm:$0xff] }
 0x22c   : > { %v1435_v20 = vpop.eup %1434 }
 0x22d   : > { %1318 = vmatmul.mubr.msk.f32.vlgmr.msra.gmra.mxu1 %vm306_vm1, %v1435_v20  ;;  %v1437_v43 = vpop.eup %1436  ;;  %v399_v46 = vsel %vm306_vm1, %v1435_v20, 0.0 }
 0x22e   : > { %1321 = vmatpush3.xpose.msk.msra.mxu1 %vm306_vm1, %v491_v14  ;;  %1322 = vmatprep.mubr.msk.f32.mxu1 %vm1632_vm0, %v1631_v0  ;;  %v398_v7 = vmul.f32 %v1437_v43, %v397_v6 }
 0x22f   : > { %1330 = vmatprep.subr.mxu1 %v1631_v0 }
 0x231   : > { %1323 = vmatmul.mubr.msk.f32.vlgmr.msra.gmra.mxu1 %vm306_vm1, %v489_v17  ;;  %v967_v17 = vld [vmem:[#allocation3 + $0x18] sm:$0xff] }
 0x232   : > { %1331 = vmatpush3.xpose.msk.msra.mxu1 %vm306_vm1, %v684_v18  ;;  %1332 = vmatprep.mubr.msk.f32.mxu1 %vm1632_vm0, %v1631_v0 }
 0x233   : > { %1340 = vmatprep.subr.mxu1 %v1631_v0 }
 0x235   : > { %1333 = vmatmul.mubr.msk.f32.vlgmr.msra.gmra.mxu1 %vm306_vm1, %v682_v19 }
 0x236   : > { %1341 = vmatpush3.xpose.msk.msra.mxu1 %vm306_vm1, %v876_v21  ;;  %1342 = vmatprep.mubr.msk.f32.mxu1 %vm1632_vm0, %v1631_v0 }
 0x239   : > { %1343 = vmatmul.mubr.msk.f32.vlgmr.msra.gmra.mxu1 %vm306_vm1, %v874_v22 }
 0x2ed   : > { %v1869_v23 = vpop.f32.mrf.mxu1 }
 0x2ef   : > { %v1319_v24 = vpop.f32.mrf.mxu1 }
 0x2f1   : > { %v562_v25 = vpop.f32.mrf.mxu1 }
 0x2f2   : > { %v568_v26 = vsel %vm306_vm1, %v562_v25, -inf }
 0x2f3   : > { %569 = vmax.xlane.f32.xlu1 %v568_v26  ;;  %v1324_v27 = vpop.f32.mrf.mxu1 }
 0x2f5   : > { %v755_v28 = vpop.f32.mrf.mxu1 }
 0x2f6   : > { %v761_v29 = vsel %vm306_vm1, %v755_v28, -inf }
 0x2f7   : > { %762 = vmax.xlane.f32.xlu0 %v761_v29  ;;  %v1334_v30 = vpop.f32.mrf.mxu1 }
 0x2f9   : > { %v947_v31 = vpop.f32.mrf.mxu1 }
 0x2fa   : > { %v953_v32 = vsel %vm306_vm1, %v947_v31, -inf }
 0x2fb   : > { %954 = vmax.xlane.f32.xlu1 %v953_v32  ;;  %v1344_v33 = vpop.f32.mrf.mxu1 }
 0x37c   : > { %v570_v35 = vpop.xlane.xlu1 %569 }
 0x37d   : > { %v571_v36 = vmax.f32 %v567_v34, %v570_v35 }
 0x37f   : > { %680 = vst.msk [vmem:[#allocation2 + $0x8] sm:$0xff] %vm291_vm2, %v571_v36  ;;  %576 = vperm.xlu1 %1433, %v571_v36   ;;  %v572_v45 = vsub.f32 %v567_v34, %v571_v36 }
 0x380   : > { %v763_v38 = vpop.xlane.xlu0 %762 }
 0x381   : > { %v764_v39 = vmax.f32 %v760_v37, %v763_v38  ;;  %1438 = vpow2.f32 %v572_v45 }
 0x383   : > { %872 = vst.msk [vmem:[#allocation2 + $0x10] sm:$0xff] %vm291_vm2, %v764_v39  ;;  %769 = vperm.xlu0 %1432, %v764_v39   ;;  %597 = vrot.lane.b32.xlu1 %v1849_v12, %s1635_s18  ;;  %v765_v47 = vsub.f32 %v760_v37, %v764_v39 }
 0x384   : > { %v955_v41 = vpop.xlane.xlu1 %954 }
 0x385   : > { %v956_v42 = vmax.f32 %v1876_v40, %v955_v41  ;;  %1440 = vpow2.f32 %v765_v47 }
 0x387   : > { %v957_v44 = vsub.f32 %v1876_v40, %v956_v42  ;;  %1064 = vst.msk [vmem:[#allocation2 + $0x18] sm:$0xff] %vm291_vm2, %v956_v42  ;;  %961 = vperm.xlu1 %1433, %v956_v42   ;;  %408 = vperm.xlu0 %1432, %v1437_v43  }
 0x38b   : > { %789 = vrot.lane.b32.xlu1 %v1849_v12, %s1636_s24 }
 0x38e   : > { %v1439_v48 = vpop.eup %1438 }
 0x38f   : > { %981 = vrot.lane.b32.xlu1 %v1849_v12, %s1637_s5  ;;  %v583_v11 = vmul.f32 %v1439_v48, %v582_v10 }
 0x392   : > { %v1441_v49 = vpop.eup %1440 }
 0x3b3   : > { %400 = vadd.xlane.f32.xlu1 %v399_v46 }
 0x3c4   : > { %592 = vperm.xlu1 %1433, %v1439_v48  }
 0x3c8   : > { %785 = vperm.xlu1 %1433, %v1441_v49  }
 0x3fa   : > { %v577_v50 = vpop.permute.xlu1 %576 }
 0x3fb   : > { %v579_v51 = vsub.f32 %v562_v25, %v577_v50 }
 0x3fd   : > { %1442 = vpow2.f32 %v579_v51 }
 0x3fe   : > { %v770_v52 = vpop.permute.xlu0 %769  ;;  %v598_v53 = vpop.permute.xlu1 %597 }
 0x3ff   : > { %v772_v54 = vsub.f32 %v755_v28, %v770_v52  ;;  %1326 = vmatpush3.msra.mxu0 %v598_v53 }
 0x400   : > { %1335 = vmatprep.subr.mxu0 %v1631_v0 }
 0x401   : > { %1444 = vpow2.f32 %v772_v54 }
 0x402   : > { %v962_v56 = vpop.permute.xlu1 %961  ;;  %v409_v57 = vpop.permute.xlu0 %408 }
 0x403   : > { %v964_v58 = vsub.f32 %v947_v31, %v962_v56  ;;  %v411_v59 = vmul.f32 %v409_v57, %v405_v55 }
 0x405   : > { %1446 = vpow2.f32 %v964_v58  ;;  %v485_v60 = vadd.f32 %v1869_v23, %v411_v59 }
 0x406   : > { %v790_v61 = vpop.permute.xlu1 %789  ;;  %1448 = vpow2.f32 %v957_v44 }
 0x407   : > { %486 = vst.msk [vmem:[#allocation4] sm:$0xff] %vm306_vm1, %v485_v60 }
 0x40a   : > { %v1443_v62 = vpop.eup %1442  ;;  %v982_v1 = vpop.permute.xlu1 %981 }
 0x40b   : > { %1328 = vmatmul.mubr.msk.f32.vlgmr.msra.gmra.mxu0 %vm306_vm1, %v1443_v62  ;;  %v584_v63 = vsel %vm306_vm1, %v1443_v62, 0.0 }
 0x40c   : > { %585 = vadd.xlane.f32.xlu0 %v584_v63  ;;  %1336 = vmatpush3.msra.mxu0 %v790_v61 }
 0x40d   : > { %1337 = vmatprep.mubr.msk.f32.mxu0 %vm1632_vm0, %v1631_v0  ;;  %1345 = vmatprep.subr.mxu0 %v1631_v0 }
 0x40e   : > { %v1445_v2 = vpop.eup %1444 }
 0x40f   : > { %1338 = vmatmul.mubr.msk.f32.vlgmr.msra.gmra.mxu0 %vm306_vm1, %v1445_v2  ;;  %v777_v3 = vsel %vm306_vm1, %v1445_v2, 0.0 }
 0x410   : > { %778 = vadd.xlane.f32.xlu0 %v777_v3  ;;  %1346 = vmatpush3.msra.mxu0 %v982_v1 }
 0x411   : > { %1347 = vmatprep.mubr.msk.f32.mxu0 %vm1632_vm0, %v1631_v0  ;;  %v776_v0 = vmul.f32 %v1441_v49, %v775_v13  ;;  %v589_v49 = vld [vmem:[#allocation4] sm:$0xff] }
 0x412   : > { %v1447_v4 = vpop.eup %1446 }
 0x413   : > { %1348 = vmatmul.mubr.msk.f32.vlgmr.msra.gmra.mxu0 %vm306_vm1, %v1447_v4  ;;  %v969_v5 = vsel %vm306_vm1, %v1447_v4, 0.0  ;;  %v1449_v15 = vpop.eup %1448 }
 0x414   : > { %970 = vadd.xlane.f32.xlu0 %v969_v5  ;;  %v968_v19 = vmul.f32 %v1449_v15, %v967_v17 }
 0x43c   : > { %v401_v8 = vpop.xlane.xlu1 %400 }
 0x43d   : > { %v402_v9 = vadd.f32 %v401_v8, %v398_v7 }
 0x43f   : > { %404 = vst.msk [vmem:[#allocation3] sm:$0xff] %vm291_vm2, %v402_v9 }
 0x440   : > { %v593_v48 = vpop.permute.xlu1 %592 }
 0x441   : > { %v595_v50 = vmul.f32 %v593_v48, %v589_v49 }
 0x444   : > { %v786_v53 = vpop.permute.xlu1 %785 }
 0x446   : > { %v1068_v22 = vld [vmem:[#allocation3] sm:$0xff] }
 0x447   : > { %1450 = vrcp.f32 %v1068_v22 }
 0x454   : > { %v1451_v25 = vpop.eup %1450 }
 0x455   : > { %v1070_v27 = vmul.f32 %v1451_v25, %v1068_v22 }
 0x457   : > { %v1071_v29 = vsub.f32 2.0, %v1070_v27 }
 0x459   : > { %v1072_v33 = vmul.f32 %v1451_v25, %v1071_v29 }
 0x495   : > { %v586_v12 = vpop.xlane.xlu0 %585 }
 0x496   : > { %v587_v14 = vadd.f32 %v586_v12, %v583_v11 }
 0x498   : > { %588 = vst.msk [vmem:[#allocation3 + $0x8] sm:$0xff] %vm291_vm2, %v587_v14 }
 0x499   : > { %v779_v16 = vpop.xlane.xlu0 %778 }
 0x49a   : > { %v780_v18 = vadd.f32 %v779_v16, %v776_v0 }
 0x49c   : > { %781 = vst.msk [vmem:[#allocation3 + $0x10] sm:$0xff] %vm291_vm2, %v780_v18 }
 0x49d   : > { %v971_v20 = vpop.xlane.xlu0 %970 }
 0x49e   : > { %v972_v21 = vadd.f32 %v971_v20, %v968_v19 }
 0x49f   : > { %v1081_v24 = vld [vmem:[#allocation3 + $0x8] sm:$0xff] }
 0x4a0   : > { %973 = vst.msk [vmem:[#allocation3 + $0x18] sm:$0xff] %vm291_vm2, %v972_v21 }
 0x4a3   : > { %v1094_v23 = vld [vmem:[#allocation3 + $0x10] sm:$0xff] }
 0x4a4   : > { %1452 = vrcp.f32 %v1094_v23 }
 0x4a5   : > { %1454 = vrcp.f32 %v1081_v24 }
 0x4a7   : > { %v1107_v26 = vld [vmem:[#allocation3 + $0x18] sm:$0xff] }
 0x4a8   : > { %1456 = vrcp.f32 %v1107_v26 }
 0x4b1   : > { %v1453_v28 = vpop.eup %1452 }
 0x4b2   : > { %v1096_v30 = vmul.f32 %v1453_v28, %v1094_v23  ;;  %v1455_v35 = vpop.eup %1454 }
 0x4b3   : > { %v1083_v39 = vmul.f32 %v1455_v35, %v1081_v24 }
 0x4b4   : > { %v1097_v34 = vsub.f32 2.0, %v1096_v30 }
 0x4b5   : > { %v1457_v40 = vpop.eup %1456  ;;  %v1084_v43 = vsub.f32 2.0, %v1083_v39 }
 0x4b6   : > { %v1098_v38 = vmul.f32 %v1453_v28, %v1097_v34  ;;  %v1109_v44 = vmul.f32 %v1457_v40, %v1107_v26 }
 0x4b7   : > { %v1085_v45 = vmul.f32 %v1455_v35, %v1084_v43 }
 0x4b8   : > { %v1110_v46 = vsub.f32 2.0, %v1109_v44 }
 0x4ba   : > { %v1111_v47 = vmul.f32 %v1457_v40, %v1110_v46 }
 0x4cb   : > { %v669_v31 = vpop.f32.mrf.mxu0 }
 0x4cc   : > { %674 = vrot.lane.b32.xlu0 %v669_v31, %s1638_s6 }
 0x4cd   : > { %v1329_v32 = vpop.f32.mrf.mxu0 }
 0x4cf   : > { %v861_v36 = vpop.f32.mrf.mxu0 }
 0x4d0   : > { %866 = vrot.lane.b32.xlu1 %v861_v36, %s1639_s1  ;;  %1076 = vperm.xlu0 %1432, %v1072_v33  }
 0x4d1   : > { %v1339_v37 = vpop.f32.mrf.mxu0 }
 0x4d3   : > { %v1053_v41 = vpop.f32.mrf.mxu0 }
 0x4d4   : > { %977 = vperm.xlu1 %1433, %v1449_v15   ;;  %1102 = vperm.xlu0 %1432, %v1098_v38  }
 0x4d5   : > { %v1349_v42 = vpop.f32.mrf.mxu0 }
 0x4d8   : > { %1058 = vrot.lane.b32.xlu1 %v1053_v41, %s1640_s7 }
 0x4dc   : > { %1089 = vperm.xlu1 %1433, %v1085_v45  }
 0x4e0   : > { %1115 = vperm.xlu1 %1433, %v1111_v47  }
 0x53e   : > { %v675_v51 = vpop.permute.xlu0 %674 }
 0x53f   : > { %v677_v52 = vadd.f32 %v675_v51, %v595_v50 }
 0x541   : > { %679 = vst.msk [vmem:[#allocation4] sm:$0xff] %vm678_vm4, %v677_v52 }
 0x542   : > { %v867_v56 = vpop.permute.xlu1 %866 }
 0x548   : > { %v782_v54 = vld [vmem:[#allocation4] sm:$0xff] }
 0x549   : > { %v788_v55 = vmul.f32 %v786_v53, %v782_v54 }
 0x54b   : > { %v869_v57 = vadd.f32 %v867_v56, %v788_v55  ;;  %v1077_v63 = vpop.permute.xlu0 %1076 }
 0x54d   : > { %871 = vst.msk [vmem:[#allocation4] sm:$0xff] %vm870_vm5, %v869_v57 }
 0x54f   : > { %v978_v58 = vpop.permute.xlu1 %977  ;;  %v1103_v5 = vpop.permute.xlu0 %1102 }
 0x553   : > { %v1059_v61 = vpop.permute.xlu1 %1058 }
 0x554   : > { %v974_v59 = vld [vmem:[#allocation4] sm:$0xff] }
 0x555   : > { %v980_v60 = vmul.f32 %v978_v58, %v974_v59 }
 0x557   : > { %v1061_v62 = vadd.f32 %v1059_v61, %v980_v60  ;;  %v1090_v1 = vpop.permute.xlu1 %1089 }
 0x559   : > { %1063 = vst.msk [vmem:[#allocation4] sm:$0xff] %vm1062_vm6, %v1061_v62 }
 0x55b   : > { %v1116_v6 = vpop.permute.xlu1 %1115 }
 0x560   : > { %v1086_v2 = vld [vmem:[#allocation4] sm:$0xff] }
 0x561   : > { %v1092_v3 = vmul.f32 %v1090_v1, %v1086_v2  ;;  %v1079_v4 = vmul.f32 %v1086_v2, %v1077_v63  ;;  %v1105_v7 = vmul.f32 %v1103_v5, %v1086_v2  ;;  %v1118_v8 = vmul.f32 %v1116_v6, %v1086_v2 }
 0x563   : > { %1080 = vst.msk [vmem:[%s286_s22] sm:$0xff] %vm306_vm1, %v1079_v4 }
 0x564   : > { %1093 = vst.msk [vmem:[%s286_s22] sm:$0xff] %vm678_vm4, %v1092_v3 }
 0x565   : > { %1106 = vst.msk [vmem:[%s286_s22] sm:$0xff] %vm870_vm5, %v1105_v7 }
 0x566   : > { %1119 = vst.msk [vmem:[%s286_s22] sm:$0xff] %vm1062_vm6, %v1118_v8 }
 0x567   : > { %1555 = shalt.err (!%p1552_p12)
}
 0x568   : > { %s1556_s30 = scalar_lea.hbm %s1917_s29, 128  ;;  %s1560_s18 = scalar_lea.hbm %s1964_s3, 256 }
 0x569   : > { %p1557_p1 = scmp.ne.s32.totalorder %s1917_s29, %s1556_s30  ;;  %p1561_p6 = scmp.lt.s32.totalorder %s1917_s29, %s1964_s3 }
 0x56a   : > { %p1562_p7 = scmp.lt.s32.totalorder %s1560_s18, %s1556_s30 }
 0x56b   : > { %p1558_p2 = pnand %p1557_p1, %p1717_p9 }
 0x56c   : > { %p1563_p8 = por %p1562_p7, %p1561_p6 }
 0x56d   : > { %p1559_p5 = pneg %p1558_p2 }
 0x56f   : > { %p1564_p0 = pnand %p1563_p8, %p1559_p5 }
 0x571   : > { %1567 = shalt.err (!%p1564_p0)
}
 0x572   : > { %1356 = dma.vmem_to_hbm [thread:$0]  (%p1717_p9), %s1136_s16, 128, %s1917_s29, %s1121_s15  }
 0x573 PF: > { %s1147_s10 = sand.u32 1, %s1606_s12   ;;  %p1979_p3 = scmp.ge.s32.totalorder %s1626_s17, 2 }
 0x574   : > { %s1148_s6 = scalar_lea.sflag [#allocation7], %s1147_s10 }
 0x575   : > { %p1369_p4 = pnand %p1979_p3, %p1724_p11 }
 0x577   : > { %p1370_p10 = pneg %p1369_p4 }
 0x579   : > { %1601 = dma.done.wait (%p1370_p10), %s1148_s6, 128  }
 0x57a   : > { %1603 = vsyncadd (%p1370_p10), %s1148_s6, 4294967168  ;;  %s22_s17 = sadd.s32 1, %s1626_s17   ;;  %s1980_s15 = sld [smem:[#allocation15_spill]] }
 0x57b   : > { %p19_p13 = scmp.ge.s32.totalorder %s22_s17, 4   ;;  %s1981_s16 = sld [smem:[#allocation16_spill]] }
 0x57c   : > { %s1982_s12 = smov %s1610_s13  ;;  %s1983_s13 = smov %s1614_s14 }
 0x57d   : > { %s1984_s14 = smov %s1722_s26  ;;  %21 = sbr.rel (!%p19_p13) target bundleno = 10 (0xa), region = 115 }
 0x582   :  { %1153 = vsyncpa [#allocation6], 1 }
 0x583   :  { %1155 = vsyncpa [#allocation6 + $0x1], 1 }
 0x584   :  { %1156 = vsyncpa [#allocation9], 1 }
 0x585   :  { %1158 = vsyncpa [#allocation9 + $0x1], 1 }
 0x586   :  { %1159 = vsyncpa [#allocation7], 1 }
 0x587   :  { %1161 = vsyncpa [#allocation7 + $0x1], 1 }

</bundles_post_ra>
